<compile_context>
chip_gen: v7x
topology: tpu7x:2x2x1
jax: 0.10.0
libtpu: 0.0.40
codegen_flags: <defaults>
</compile_context>

<pallas_src>
import jax
import jax.numpy as jnp
from jax import lax
from jax.experimental import pallas as pl
from jax.experimental.pallas import tpu as pltpu


def _round_up(n, m):
    return ((n + m - 1) // m) * m


def _mlp_kernel(x_ref, w1_ref, b1_ref, w2_ref, b2_ref, w3_ref, b3_ref, o_ref):
    # x_ref: (TB, 12) in natural PyTorch layout (batch on sublanes here).
    x = x_ref[...]
    # h1[o, t] = sum_i w1[o, i] * x[t, i]  -> batch lands on the lane axis.
    h1 = lax.dot_general(
        w1_ref[...], x, (((1,), (1,)), ((), ())),
        preferred_element_type=jnp.float32) + b1_ref[...]            # (8, TB)
    h1 = jnp.maximum(h1, 0.0)                                         # ReLU
    h2 = jnp.dot(w2_ref[...], h1,
                 preferred_element_type=jnp.float32) + b2_ref[...]    # (4, TB)
    h2 = jnp.maximum(h2, 0.0)                                         # ReLU
    out = jnp.dot(w3_ref[...], h2,
                  preferred_element_type=jnp.float32) + b3_ref[...]   # (C, TB)
    o_ref[...] = out.astype(o_ref.dtype)


def _reference_forward(x, p):
    h1 = jnp.maximum(x @ p["w1"].T + p["b1"].T, 0.0)
    h2 = jnp.maximum(h1 @ p["w2"].T + p["b2"].T, 0.0)
    return h2 @ p["w3"].T + p["b3"].T


def ann_classifier_forward(x, params, *, block_b=8192, use_pallas=None):
    """x: [B, 12] float32.  params: w{i}: [out, in], b{i}: [out, 1].
    Returns [B, n_classes] float32 (PyTorch layout)."""
    assert block_b % 128 == 0, "batch block must be a multiple of the lane width"
    B = x.shape[0]
    C = params["w3"].shape[0]

    if use_pallas is None:
        # Kernel launch + grid overhead dominates for tiny batches.
        use_pallas = B >= 1024
    if not use_pallas:
        return _reference_forward(x, params)

    # Batch block (lane axis of the in-kernel layout), multiple of 128.
    if B <= 128:
        TB = 128
    else:
        # >= 2 grid steps whenever the batch allows it, so the "parallel"
        # batch axis has work for both v7x TensorCores.
        TB = min(block_b, _round_up(pl.cdiv(B, 2), 128))
    grid_b = pl.cdiv(B, TB)

    def resident(shape):
        # Same block every grid step -> stays resident in VMEM (no re-DMA).
        return pl.BlockSpec(shape, lambda i: (0, 0))

    flops = 2 * B * (12 * 8 + 8 * 4 + 4 * C)
    param_bytes = sum(int(p.size) * p.dtype.itemsize for p in params.values())
    bytes_accessed = B * (12 + C) * 4 + param_bytes

    out_t = pl.pallas_call(
        _mlp_kernel,
        out_shape=jax.ShapeDtypeStruct((C, B), jnp.float32),
        grid=(grid_b,),
        in_specs=[
            pl.BlockSpec((TB, 12), lambda i: (i, 0)),   # natural [B,12] input
            resident(params["w1"].shape), resident(params["b1"].shape),
            resident(params["w2"].shape), resident(params["b2"].shape),
            resident(params["w3"].shape), resident(params["b3"].shape),
        ],
        out_specs=pl.BlockSpec((C, TB), lambda i: (0, i)),  # lane-dense [C,B]
        compiler_params=pltpu.CompilerParams(
            # Independent batch blocks -> shard across v7x's two TCs.
            dimension_semantics=("parallel",),
            # (TB,12) input tile is lane-padded in VMEM (~4 MiB at TB=8192,
            # double-buffered); give headroom on every generation.
            vmem_limit_bytes=32 * 1024 * 1024,
        ),
        cost_estimate=pl.CostEstimate(
            flops=flops, transcendentals=0, bytes_accessed=bytes_accessed),
    )(x, params["w1"], params["b1"], params["w2"], params["b2"],
      params["w3"], params["b3"])

    # Single tiny (C x B) transpose back to PyTorch-style [B, n_classes].
    return out_t.T


def init_params(key, n_classes):
    """Deterministic init mimicking PyTorch's default Linear init
    (uniform(-1/sqrt(fan_in), 1/sqrt(fan_in))).  w: [out, in], b: [out, 1]."""
    dims = [(12, 8), (8, 4), (4, n_classes)]
    params = {}
    for i, (fan_in, fan_out) in enumerate(dims, start=1):
        key, kw, kb = jax.random.split(key, 3)
        bound = 1.0 / (fan_in ** 0.5)
        params[f"w{i}"] = jax.random.uniform(
            kw, (fan_out, fan_in), jnp.float32, minval=-bound, maxval=bound)
        params[f"b{i}"] = jax.random.uniform(
            kb, (fan_out, 1), jnp.float32, minval=-bound, maxval=bound)
    return params


if __name__ == "__main__":
    key = jax.random.PRNGKey(0)
    key, kx1, kx2 = jax.random.split(key, 3)

    n_classes = 3
    params = init_params(key, n_classes)

    # Small-batch case (matches the original test harness, B=8).  Force the
    # Pallas path so the kernel itself is exercised (partial block, grid=1).
    x_small = jax.random.normal(kx1, (8, 12), dtype=jnp.float32)
    out_small = jax.block_until_ready(
        ann_classifier_forward(x_small, params, use_pallas=True))
    ref_small = _reference_forward(x_small, params)
    assert out_small.shape == (8, n_classes)
    assert jnp.allclose(out_small, ref_small, atol=1e-5, rtol=1e-5)

    # Ragged, multi-step grid case: B=300 with a 256-lane block -> 2 grid
    # steps (exercises batch pipelining, resident weights, masked partial
    # last block on both input and output).
    x_big = jax.random.normal(kx2, (300, 12), dtype=jnp.float32)
    out_big = jax.block_until_ready(
        ann_classifier_forward(x_big, params, block_b=256, use_pallas=True))
    ref_big = _reference_forward(x_big, params)
    assert out_big.shape == (300, n_classes)
    assert jnp.allclose(out_big, ref_big, atol=1e-5, rtol=1e-5)

    print("KERNEL_OK")
</pallas_src>

<mosaic_0001>
module attributes {stable_mosaic.version = 11 : i64} {
  func.func @_mlp_kernel(%arg0: i32, %arg1: memref<128x12xf32, #tpu.memory_space<vmem>>, %arg2: memref<8x12xf32, #tpu.memory_space<vmem>>, %arg3: memref<8x1xf32, #tpu.memory_space<vmem>>, %arg4: memref<4x8xf32, #tpu.memory_space<vmem>>, %arg5: memref<4x1xf32, #tpu.memory_space<vmem>>, %arg6: memref<3x4xf32, #tpu.memory_space<vmem>>, %arg7: memref<3x1xf32, #tpu.memory_space<vmem>>, %arg8: memref<3x128xf32, #tpu.memory_space<vmem>>) attributes {dimension_semantics = [#tpu.dimension_semantics<parallel>], iteration_bounds = array<i64: 1>, scalar_prefetch = 0 : i64, scratch_operands = 0 : i64, tpu.core_type = #tpu.core_type<tc>, window_params = [{transform_indices = @transform_0, window_bounds = array<i64: 128, 12>}, {pipeline_mode = #tpu.pipeline_mode<synchronous>, transform_indices = @transform_1, window_bounds = array<i64: 8, 12>}, {pipeline_mode = #tpu.pipeline_mode<synchronous>, transform_indices = @transform_2, window_bounds = array<i64: 8, 1>}, {pipeline_mode = #tpu.pipeline_mode<synchronous>, transform_indices = @transform_3, window_bounds = array<i64: 4, 8>}, {pipeline_mode = #tpu.pipeline_mode<synchronous>, transform_indices = @transform_4, window_bounds = array<i64: 4, 1>}, {pipeline_mode = #tpu.pipeline_mode<synchronous>, transform_indices = @transform_5, window_bounds = array<i64: 3, 4>}, {pipeline_mode = #tpu.pipeline_mode<synchronous>, transform_indices = @transform_6, window_bounds = array<i64: 3, 1>}, {transform_indices = @transform_7, window_bounds = array<i64: 3, 128>}]} {
    %c0 = arith.constant 0 : index
    %c0_0 = arith.constant 0 : index
    %0 = vector.load %arg1[%c0, %c0_0] : memref<128x12xf32, #tpu.memory_space<vmem>>, vector<128x12xf32>
    %c0_1 = arith.constant 0 : index
    %c0_2 = arith.constant 0 : index
    %1 = vector.load %arg2[%c0_1, %c0_2] : memref<8x12xf32, #tpu.memory_space<vmem>>, vector<8x12xf32>
    %cst = arith.constant dense<0.000000e+00> : vector<8x128xf32>
    %2 = tpu.matmul %1, %0, %cst {dimension_numbers = #tpu.dot_dimension_numbers<[1], [1], [0], [0], [0, 0, 1, 0], [], []>} : vector<8x12xf32>, vector<128x12xf32>, vector<8x128xf32> -> vector<8x128xf32>
    %c0_3 = arith.constant 0 : index
    %c0_4 = arith.constant 0 : index
    %3 = vector.load %arg3[%c0_3, %c0_4] : memref<8x1xf32, #tpu.memory_space<vmem>>, vector<8x1xf32>
    %4 = vector.broadcast %3 : vector<8x1xf32> to vector<8x128xf32>
    %5 = arith.addf %2, %4 : vector<8x128xf32>
    %cst_5 = arith.constant 0.000000e+00 : f32
    %6 = vector.broadcast %cst_5 : f32 to vector<8x128xf32>
    %7 = arith.maximumf %5, %6 : vector<8x128xf32>
    %c0_6 = arith.constant 0 : index
    %c0_7 = arith.constant 0 : index
    %8 = vector.load %arg4[%c0_6, %c0_7] : memref<4x8xf32, #tpu.memory_space<vmem>>, vector<4x8xf32>
    %cst_8 = arith.constant dense<0.000000e+00> : vector<4x128xf32>
    %9 = tpu.matmul %8, %7, %cst_8 {dimension_numbers = #tpu.dot_dimension_numbers<[1], [0], [0], [1], [0, 0, 1, 1], [], []>} : vector<4x8xf32>, vector<8x128xf32>, vector<4x128xf32> -> vector<4x128xf32>
    %c0_9 = arith.constant 0 : index
    %c0_10 = arith.constant 0 : index
    %10 = vector.load %arg5[%c0_9, %c0_10] : memref<4x1xf32, #tpu.memory_space<vmem>>, vector<4x1xf32>
    %11 = vector.broadcast %10 : vector<4x1xf32> to vector<4x128xf32>
    %12 = arith.addf %9, %11 : vector<4x128xf32>
    %cst_11 = arith.constant 0.000000e+00 : f32
    %13 = vector.broadcast %cst_11 : f32 to vector<4x128xf32>
    %14 = arith.maximumf %12, %13 : vector<4x128xf32>
    %c0_12 = arith.constant 0 : index
    %c0_13 = arith.constant 0 : index
    %15 = vector.load %arg6[%c0_12, %c0_13] : memref<3x4xf32, #tpu.memory_space<vmem>>, vector<3x4xf32>
    %cst_14 = arith.constant dense<0.000000e+00> : vector<3x128xf32>
    %16 = tpu.matmul %15, %14, %cst_14 {dimension_numbers = #tpu.dot_dimension_numbers<[1], [0], [0], [1], [0, 0, 1, 1], [], []>} : vector<3x4xf32>, vector<4x128xf32>, vector<3x128xf32> -> vector<3x128xf32>
    %c0_15 = arith.constant 0 : index
    %c0_16 = arith.constant 0 : index
    %17 = vector.load %arg7[%c0_15, %c0_16] : memref<3x1xf32, #tpu.memory_space<vmem>>, vector<3x1xf32>
    %18 = vector.broadcast %17 : vector<3x1xf32> to vector<3x128xf32>
    %19 = arith.addf %16, %18 : vector<3x128xf32>
    %c0_17 = arith.constant 0 : index
    %c0_18 = arith.constant 0 : index
    %20 = vector.load %arg8[%c0_17, %c0_18] : memref<3x128xf32, #tpu.memory_space<vmem>>, vector<3x128xf32>
    tpu.vector_store %arg8[%c0_17, %c0_18], %19 {strides = array<i32>} : memref<3x128xf32, #tpu.memory_space<vmem>>, vector<3x128xf32>,
    return
  }
  func.func @transform_0(%arg0: i32) -> (i32, i32) {
    %c0_i32 = arith.constant 0 : i32
    %c0_i32_0 = arith.constant 0 : i32
    return %arg0, %c0_i32 : i32, i32
  }
  func.func @transform_1(%arg0: i32) -> (i32, i32) {
    %c0_i32 = arith.constant 0 : i32
    %c0_i32_0 = arith.constant 0 : i32
    %c0_i32_1 = arith.constant 0 : i32
    return %c0_i32, %c0_i32_0 : i32, i32
  }
  func.func @transform_2(%arg0: i32) -> (i32, i32) {
    %c0_i32 = arith.constant 0 : i32
    %c0_i32_0 = arith.constant 0 : i32
    %c0_i32_1 = arith.constant 0 : i32
    return %c0_i32, %c0_i32_0 : i32, i32
  }
  func.func @transform_3(%arg0: i32) -> (i32, i32) {
    %c0_i32 = arith.constant 0 : i32
    %c0_i32_0 = arith.constant 0 : i32
    %c0_i32_1 = arith.constant 0 : i32
    return %c0_i32, %c0_i32_0 : i32, i32
  }
  func.func @transform_4(%arg0: i32) -> (i32, i32) {
    %c0_i32 = arith.constant 0 : i32
    %c0_i32_0 = arith.constant 0 : i32
    %c0_i32_1 = arith.constant 0 : i32
    return %c0_i32, %c0_i32_0 : i32, i32
  }
  func.func @transform_5(%arg0: i32) -> (i32, i32) {
    %c0_i32 = arith.constant 0 : i32
    %c0_i32_0 = arith.constant 0 : i32
    %c0_i32_1 = arith.constant 0 : i32
    return %c0_i32, %c0_i32_0 : i32, i32
  }
  func.func @transform_6(%arg0: i32) -> (i32, i32) {
    %c0_i32 = arith.constant 0 : i32
    %c0_i32_0 = arith.constant 0 : i32
    %c0_i32_1 = arith.constant 0 : i32
    return %c0_i32, %c0_i32_0 : i32, i32
  }
  func.func @transform_7(%arg0: i32) -> (i32, i32) {
    %c0_i32 = arith.constant 0 : i32
    %c0_i32_0 = arith.constant 0 : i32
    return %c0_i32, %arg0 : i32, i32
  }
}

</mosaic_0001>

<bundles_post_ra>
// kernel: tpu_custom_call.1
= control target key start
LH: loop header
LB: loop body
LE: loop exit
PB: predicated region body
PF: predicated region fallthrough
CT: control target
= control target key end

     0   :  { %vm50_vm0 = vcmask 97280   ;;  %v504_v2 = vmov 0.0|0.0   ;;  %vm505_vm2 = vmmov 0   ;;  %v506_v5 = vmov 0.0   ;;  %s653_s0 = inlined_call_operand.vmem [shape: f32[8,12], index: 0, kind: input, shape index: {}]   ;;  %s654_s1 = inlined_call_operand.vmem [shape: f32[8,12], index: 1, kind: input, shape index: {}]   ;;  %s655_s2 = inlined_call_operand.vmem [shape: f32[8,1], index: 2, kind: input, shape index: {}]   ;;  %s656_s3 = inlined_call_operand.vmem [shape: f32[4,8], index: 3, kind: input, shape index: {}]   ;;  %s657_s4 = inlined_call_operand.vmem [shape: f32[4,1], index: 4, kind: input, shape index: {}]   ;;  %s658_s5 = inlined_call_operand.vmem [shape: f32[3,4], index: 5, kind: input, shape index: {}]   ;;  %s659_s6 = inlined_call_operand.vmem [shape: f32[3,1], index: 6, kind: input, shape index: {}]   ;;  %s660_s7 = inlined_call_operand.hbm [shape: f32[3,8], index: 7, kind: output, shape index: {}]  }
   0x1   :  { %v27_v0 = vld [vmem:[%s653_s0] sm:$0xff]  ;;  %v28_v1 = vld [vmem:[%s653_s0 + $0x8] sm:$0xff]  ;;  %441 = vmatprep.subr.bf16.mxu0 %v504_v2  ;;  %vm557_vm1 = vmpackc.low %vm50_vm0, %vm50_vm0  ;;  %428 = vmatprep.mubr.msk.f32.mxu0 %vm505_vm2, %v506_v5  ;;  %v507_v6 = vmov 0  }
   0x2   :  { %v442_v3 = vpack.c.bf16 %v28_v1, %v27_v0  ;;  %478 = vset.pattern.permute.xlu0 %v507_v6  ;;  %431 = vmatprep.subr.mxu1 %v506_v5  ;;  %v29_v7 = vld [vmem:[%s653_s0 + $0x10] sm:$0xff]  ;;  %v30_v8 = vld [vmem:[%s653_s0 + $0x18] sm:$0xff]  ;;  %v44_v9 = vld [vmem:[%s655_s2] sm:$0xff] }
   0x3   :  { %433 = vmatprep.mubr.msk.f32.mxu1 %vm505_vm2, %v506_v5  ;;  %479 = vset.pattern.permute.xlu1 %v507_v6 }
   0x4   :  { %444 = vmatpush3.bf16.xpose.msk.msra.mxu0 %vm557_vm1, %v442_v3 }
   0x5   :  { %445 = vmatprep.subr.bf16.mxu0 %v504_v2 }
   0x6   :  { %12 = vsyncpa [#allocation3], 0  ;;  %v446_v10 = vpack.c.bf16 %v30_v8, %v29_v7  ;;  %47 = vperm.xlu0 %478, %v44_v9   ;;  %v174_v11 = vld [vmem:[%s657_s4] sm:$0xf]  ;;  %v32_v13 = vld [vmem:[%s653_s0 + $0x28] sm:$0xff]  ;;  %vm180_vm3 = vcmask 64512  }
   0x7   :  { %v31_v12 = vld [vmem:[%s653_s0 + $0x20] sm:$0xff]  ;;  %v33_v15 = vld [vmem:[%s653_s0 + $0x30] sm:$0xff]  ;;  %v34_v16 = vld [vmem:[%s653_s0 + $0x38] sm:$0xff]  ;;  %vm266_vm4 = vcmask 1043456   ;;  %vm262_vm5 = vcmask 31744  }
   0x8   :  { %v450_v14 = vpack.c.bf16 %v32_v13, %v31_v12  ;;  %v454_v17 = vpack.c.bf16 %v34_v16, %v33_v15  ;;  %v35_v18 = vld [vmem:[%s653_s0 + $0x40] sm:$0xff]  ;;  %v36_v19 = vld [vmem:[%s653_s0 + $0x48] sm:$0xff]  ;;  %v37_v21 = vld [vmem:[%s653_s0 + $0x50] sm:$0xff] }
   0x9   :  { %v458_v20 = vpack.c.bf16 %v36_v19, %v35_v18  ;;  %v38_v22 = vld [vmem:[%s653_s0 + $0x58] sm:$0xff]  ;;  %v39_v24 = vld [vmem:[%s653_s0 + $0x60] sm:$0xff]  ;;  %v40_v25 = vld [vmem:[%s653_s0 + $0x68] sm:$0xff] }
   0xa   :  { %177 = vperm.xlu0 %478, %v174_v11   ;;  %v462_v23 = vpack.c.bf16 %v38_v22, %v37_v21  ;;  %v466_v26 = vpack.c.bf16 %v40_v25, %v39_v24  ;;  %v41_v27 = vld [vmem:[%s653_s0 + $0x70] sm:$0xff]  ;;  %v42_v28 = vld [vmem:[%s653_s0 + $0x78] sm:$0xff]  ;;  %v43_v30 = vld [vmem:[%s654_s1] sm:$0xff] }
   0xb   :  { %v470_v29 = vpack.c.bf16 %v42_v28, %v41_v27  ;;  %v173_v36 = vld [vmem:[%s656_s3] sm:$0xf]  ;;  %s508_s3 = smov [#allocation2]  }
   0xc   :  { %448 = vmatpush3.bf16.xpose.msk.msra.mxu0 %vm557_vm1, %v446_v10  ;;  %v256_v37 = vld [vmem:[%s659_s6] sm:$0x7]  ;;  %s347_s4 = sshll.u32 %s508_s3, 4  ;;  %s348_s4 = int_to_ptr.vmem [resolvable:$true] %s347_s4 }
   0xd   :  { %449 = vmatprep.subr.bf16.mxu0 %v504_v2  ;;  %259 = vperm.xlu1 %479, %v256_v37   ;;  %v255_v43 = vld [vmem:[%s658_s5] sm:$0x7]  ;;  %s480_s6 = scalar_lea.vmem %s348_s4, 64  ;;  %p485_p1 = scmp.lt.s32.totalorder %s348_s4, %s348_s4 }
   0xe   :  { %p481_p0 = scmp.ne.s32.totalorder %s348_s4, %s480_s6  ;;  %p486_p2 = scmp.lt.s32.totalorder %s480_s6, %s480_s6 }
  0x10   :  { %p487_p3 = por %p486_p2, %p485_p1 }
  0x12   :  { %p488_p4 = pnand %p487_p3, %p481_p0 }
  0x14   :  { %452 = vmatpush3.bf16.xpose.msk.msra.mxu0 %vm557_vm1, %v450_v14 }
  0x15   :  { %453 = vmatprep.subr.bf16.mxu0 %v504_v2 }
  0x1c   :  { %456 = vmatpush3.bf16.xpose.msk.msra.mxu0 %vm557_vm1, %v454_v17 }
  0x1d   :  { %457 = vmatprep.subr.bf16.mxu0 %v504_v2 }
  0x24   :  { %460 = vmatpush3.bf16.xpose.msk.msra.mxu0 %vm557_vm1, %v458_v20 }
  0x25   :  { %461 = vmatprep.subr.bf16.mxu0 %v504_v2 }
  0x2c   :  { %464 = vmatpush3.bf16.xpose.msk.msra.mxu0 %vm557_vm1, %v462_v23 }
  0x2d   :  { %465 = vmatprep.subr.bf16.mxu0 %v504_v2 }
  0x34   :  { %468 = vmatpush3.bf16.xpose.msk.msra.mxu0 %vm557_vm1, %v466_v26 }
  0x35   :  { %469 = vmatprep.subr.bf16.mxu0 %v504_v2 }
  0x3c   :  { %472 = vmatpush3.bf16.xpose.msk.msra.mxu0 %vm557_vm1, %v470_v29 }
  0x43   :  { %429 = vmatmul.mubr.msk.f32.vlgmr.msra.gmra.mrb[0].mxu0 %vm50_vm0, %v43_v30 }
  0x85   :  { %v48_v31 = vpop.permute.xlu0 %47 }
  0x89   :  { %v178_v38 = vpop.permute.xlu0 %177 }
  0x8c   :  { %v260_v44 = vpop.permute.xlu1 %259 }
 0x116   :  { %v168_v32 = vpop.f32.mrb[0].mxu0 }
 0x117   :  { %v169_v33 = vadd.f32 %v168_v32, %v48_v31  ;;  %v430_v34 = vpop.f32.mrb[1].mxu0 }
 0x119   :  { %v172_v35 = vmax.f32 %v169_v33, 0.0 }
 0x11b   :  { %432 = vmatpush3.msra.mxu1 %v172_v35 }
 0x11c   :  { %434 = vmatmul.mubr.msk.f32.vlgmr.msra.gmra.mrb[0].mxu1 %vm180_vm3, %v173_v36  ;;  %436 = vmatprep.subr.mxu1 %v506_v5 }
 0x11d   :  { %438 = vmatprep.mubr.msk.f32.mxu1 %vm505_vm2, %v506_v5 }
 0x1ef   :  { %v250_v39 = vpop.f32.mrb[0].mxu1 }
 0x1f0   :  { %v251_v40 = vadd.f32 %v250_v39, %v178_v38  ;;  %v435_v41 = vpop.f32.mrb[1].mxu1 }
 0x1f2   :  { %v254_v42 = vmax.f32 %v251_v40, 0.0 }
 0x1f4   :  { %437 = vmatpush3.msk.msra.mxu1 %vm266_vm4, %v254_v42 }
 0x1f5   :  { %439 = vmatmul.mubr.msk.f32.vlgmr.msra.gmra.mrb[2].mxu1 %vm262_vm5, %v255_v43 }
 0x2c8   :  { %v336_v45 = vpop.f32.mrb[2].mxu1 }
 0x2c9   :  { %v337_v46 = vadd.f32 %v336_v45, %v260_v44  ;;  %v440_v47 = vpop.f32.mrb[3].mxu1 }
 0x2cb   :  { %340 = vst [vmem:[#allocation2] sm:$0x7] %v337_v46 }
 0x2cc   :  { %491 = shalt.err (!%p488_p4)
}
 0x2cd   :  { %s492_s18 = scalar_lea.hbm %s660_s7, 64 }
 0x2ce   :  { %p493_p5 = scmp.ne.s32.totalorder %s660_s7, %s492_s18  ;;  %p496_p6 = scmp.lt.u32.totalorder %s492_s18, %s660_s7 }
 0x2d0   :  { %p498_p7 = pnand %p496_p6, %p493_p5 }
 0x2d2   :  { %501 = shalt.err (!%p498_p7)
}
 0x2d3   :  { %350 = dma.vmem_to_hbm [thread:$0]  %s348_s4, 64, %s660_s7, [#allocation3]  }
 0x2d4   :  { %502 = dma.done.wait [#allocation3], 64  }
 0x2d5   :  { %503 = vsyncadd [#allocation3], 4294967232 }
 0x2d6   :  { %354 = vsyncpa [#allocation3], 1 }

</bundles_post_ra>
